<compile_context>
chip_gen: v6e
topology: v6e:2x2x1
jax: 0.10.0
libtpu: 0.0.40
codegen_flags: <defaults>
</compile_context>

<pallas_src>
import functools

import jax
import jax.numpy as jnp
from jax.experimental import pallas as pl
from jax.experimental.pallas import tpu as pltpu

IGNORE_INDEX = -100


# ---------------------------------------------------------------------------
# Generation-aware sizing helpers.
# ---------------------------------------------------------------------------
def _round_up(x, m):
    return ((x + m - 1) // m) * m


@functools.lru_cache(maxsize=None)
def _num_tensorcores():
    """TensorCores one Pallas grid can shard over (megacore/v7x = 2, else 1)."""
    try:
        kind = jax.devices()[0].device_kind.lower()
    except Exception:
        return 1
    if 'v5e' in kind or 'v5 lite' in kind or 'v5lite' in kind or 'v6' in kind:
        return 1
    if 'v4' in kind or 'v5' in kind or 'v7' in kind or '7x' in kind:
        return 2
    return 1


@functools.lru_cache(maxsize=None)
def _vmem_params():
    """(per-tile VMEM budget, scoped vmem_limit_bytes) for this generation."""
    cap = None
    try:
        cap = int(pltpu.get_tpu_info().vmem_capacity_bytes)
    except Exception:
        cap = None
    if cap is None:
        try:
            kind = jax.devices()[0].device_kind.lower()
        except Exception:
            kind = ''
        cap = (128 * 1024 * 1024
               if ('v4' in kind or 'v5' in kind or 'v6' in kind)
               else 64 * 1024 * 1024)
    if cap >= 96 * 1024 * 1024:                       # v5e / v6e (128 MiB VMEM)
        return 64 * 1024 * 1024, 96 * 1024 * 1024
    return 20 * 1024 * 1024, 40 * 1024 * 1024          # v7x (64 MiB VMEM)


def _sublane_align(dtype):
    """Sublane packing of the dtype: 8 rows f32, 16 bf16, 32 int8/fp8."""
    return max(8, 32 // jnp.dtype(dtype).itemsize)


def _pick_tile(total, other_dim, itemsize, align, max_tile, budget):
    """Tiled-axis extent: as big as the VMEM budget allows (or the full axis)."""
    # 2 double-buffered native-dtype input buffers + ~2 f32 temporaries.
    per_unit = other_dim * (2 * itemsize + 8) + 64
    t = (budget // per_unit) // align * align
    t = max(align, min(t, max_tile))
    if t >= total:
        return int(total)        # single full-extent block (always layout-legal)
    return int(t)


def _split_grid(n_tiles):
    """(parallel supertiles, serial tiles per supertile); supertiles = #TCs."""
    num_super = max(1, min(n_tiles, _num_tensorcores()))
    tiles_per = -(-n_tiles // num_super)
    return num_super, tiles_per


def _reduce_partials(out):
    """out: (num_super*8, 128); sum on sublane 0, valid-count on sublane 1."""
    total = jnp.sum(out[0::8, 0])
    count = jnp.sum(out[1::8, 0])
    # NOTE: torch returns NaN for an all-ignored batch; we return 0 instead.
    return total / jnp.maximum(count, 1.0)


# ---------------------------------------------------------------------------
# Kernel 1a: masked cross-entropy, wide-vocab layout: block (tile_rows, V).
# ---------------------------------------------------------------------------
def _ce_row_kernel(logits_ref, labels_ref, out_ref, sum_ref, cnt_ref):
    t = pl.program_id(1)

    @pl.when(t == 0)
    def _():
        sum_ref[...] = jnp.zeros_like(sum_ref)
        cnt_ref[...] = jnp.zeros_like(cnt_ref)

    x = logits_ref[...]                          # (tm, V), native dtype
    labels = labels_ref[...]                     # (tm, 1), int32

    m = jnp.max(x, axis=-1, keepdims=True)                          # native
    e = jnp.exp((x - m).astype(jnp.float32))                        # f32 chain
    lse = jnp.log(jnp.sum(e, axis=-1, keepdims=True)) + m.astype(jnp.float32)

    col = jax.lax.broadcasted_iota(jnp.int32, x.shape, 1)
    tgt = jnp.sum(jnp.where(col == labels, x, jnp.zeros_like(x)),
                  axis=-1, keepdims=True).astype(jnp.float32)

    valid = labels != IGNORE_INDEX                                   # (tm, 1)
    # where (not multiply) so garbage boundary / overhang rows contribute 0.
    per_row = jnp.where(valid, lse - tgt, 0.0)

    sum_ref[...] += jnp.sum(per_row, axis=(0, 1), keepdims=True)
    cnt_ref[...] += jnp.sum(valid.astype(jnp.float32), axis=(0, 1), keepdims=True)

    @pl.when(t == pl.num_programs(1) - 1)
    def _():
        sub = jax.lax.broadcasted_iota(jnp.int32, out_ref.shape, 0)
        out_ref[...] = jnp.where(sub == 0, sum_ref[...],
                                 jnp.where(sub == 1, cnt_ref[...], 0.0))


def _ce_rows(logits, labels, *, tile_rows=None):
    N, V = logits.shape
    budget, vmem_limit = _vmem_params()
    if tile_rows is None:
        tile_rows = _pick_tile(N, V, logits.dtype.itemsize,
                               align=_sublane_align(logits.dtype),
                               max_tile=1024, budget=budget)
    tile_rows = int(min(tile_rows, N))
    n_blocks = pl.cdiv(N, tile_rows)
    num_super, tiles_per = _split_grid(n_blocks)
    n_pad = num_super * tiles_per * tile_rows

    # Only the (tiny) labels are padded; the logits stay un-copied in HBM.
    labels_p = jnp.pad(labels.astype(jnp.int32), (0, n_pad - N),
                       constant_values=IGNORE_INDEX).reshape(n_pad, 1)

    out = pl.pallas_call(
        _ce_row_kernel,
        out_shape=jax.ShapeDtypeStruct((num_super * 8, 128), jnp.float32),
        grid_spec=pltpu.PrefetchScalarGridSpec(
            num_scalar_prefetch=0,
            grid=(num_super, tiles_per),
            in_specs=[
                # Overhang tiles clamp to the last real block; their padded
                # (IGNORE) labels zero them out in-kernel.
                pl.BlockSpec((tile_rows, V),
                             lambda s, t, tp=tiles_per, last=n_blocks - 1:
                                 (jnp.minimum(s * tp + t, last), 0)),
                pl.BlockSpec((tile_rows, 1),
                             lambda s, t, tp=tiles_per: (s * tp + t, 0)),
            ],
            out_specs=pl.BlockSpec((8, 128), lambda s, t: (s, 0)),
            scratch_shapes=[pltpu.VMEM((1, 1), jnp.float32),
                            pltpu.VMEM((1, 1), jnp.float32)],
        ),
        compiler_params=pltpu.CompilerParams(
            dimension_semantics=("parallel", "arbitrary"),
            vmem_limit_bytes=vmem_limit),
        # TODO(synk): on v5e sweep pipeline_mode=pl.Buffered(3) on the logits
        # spec if the profile still shows exposed DMA after enlarging tiles.
    )(logits, labels_p)
    return _reduce_partials(out)


# ---------------------------------------------------------------------------
# Kernel 1b: masked cross-entropy, narrow-vocab (lane-dense) layout:
# logits are (V, N) so the row axis sits on lanes; block (V, tile_cols).
# ---------------------------------------------------------------------------
def _ce_col_kernel(logits_ref, labels_ref, out_ref, sum_ref, cnt_ref):
    t = pl.program_id(1)

    @pl.when(t == 0)
    def _():
        sum_ref[...] = jnp.zeros_like(sum_ref)
        cnt_ref[...] = jnp.zeros_like(cnt_ref)

    x = logits_ref[...]                          # (V, tc), native dtype
    labels = labels_ref[...]                     # (1, tc), int32

    m = jnp.max(x, axis=0, keepdims=True)
    e = jnp.exp((x - m).astype(jnp.float32))
    lse = jnp.log(jnp.sum(e, axis=0, keepdims=True)) + m.astype(jnp.float32)

    vidx = jax.lax.broadcasted_iota(jnp.int32, x.shape, 0)
    tgt = jnp.sum(jnp.where(vidx == labels, x, jnp.zeros_like(x)),
                  axis=0, keepdims=True).astype(jnp.float32)

    valid = labels != IGNORE_INDEX                                   # (1, tc)
    per_col = jnp.where(valid, lse - tgt, 0.0)

    sum_ref[...] += jnp.sum(per_col, axis=(0, 1), keepdims=True)
    cnt_ref[...] += jnp.sum(valid.astype(jnp.float32), axis=(0, 1), keepdims=True)

    @pl.when(t == pl.num_programs(1) - 1)
    def _():
        sub = jax.lax.broadcasted_iota(jnp.int32, out_ref.shape, 0)
        out_ref[...] = jnp.where(sub == 0, sum_ref[...],
                                 jnp.where(sub == 1, cnt_ref[...], 0.0))


def masked_cross_entropy_transposed(logits_t, labels, *, tile_cols=None):
    """logits_t: (V, N) with the row axis lane-dense; labels: (N,)."""
    V, N = logits_t.shape
    budget, vmem_limit = _vmem_params()
    if tile_cols is None:
        tile_cols = _pick_tile(N, V, logits_t.dtype.itemsize,
                               align=128, max_tile=16384, budget=budget)
    tile_cols = int(min(tile_cols, N))
    n_blocks = pl.cdiv(N, tile_cols)
    num_super, tiles_per = _split_grid(n_blocks)
    n_pad = num_super * tiles_per * tile_cols

    labels_p = jnp.pad(labels.astype(jnp.int32), (0, n_pad - N),
                       constant_values=IGNORE_INDEX).reshape(1, n_pad)

    out = pl.pallas_call(
        _ce_col_kernel,
        out_shape=jax.ShapeDtypeStruct((num_super * 8, 128), jnp.float32),
        grid_spec=pltpu.PrefetchScalarGridSpec(
            num_scalar_prefetch=0,
            grid=(num_super, tiles_per),
            in_specs=[
                pl.BlockSpec((V, tile_cols),
                             lambda s, t, tp=tiles_per, last=n_blocks - 1:
                                 (0, jnp.minimum(s * tp + t, last))),
                pl.BlockSpec((1, tile_cols),
                             lambda s, t, tp=tiles_per: (0, s * tp + t)),
            ],
            out_specs=pl.BlockSpec((8, 128), lambda s, t: (s, 0)),
            scratch_shapes=[pltpu.VMEM((1, 1), jnp.float32),
                            pltpu.VMEM((1, 1), jnp.float32)],
        ),
        compiler_params=pltpu.CompilerParams(
            dimension_semantics=("parallel", "arbitrary"),
            vmem_limit_bytes=vmem_limit),
    )(logits_t, labels_p)
    return _reduce_partials(out)


# ---------------------------------------------------------------------------
# Kernel 1c: online-softmax, vocab-tiled CE for very wide vocabularies.
# Grid (supertile, row-tile, vocab-tile); running max / sum-exp / target
# accumulators live in VMEM scratch so both block axes stay lane/sublane dense.
# ---------------------------------------------------------------------------
def _ce_vocab_tiled_kernel(logits_ref, labels_ref, out_ref,
                           m_ref, l_ref, tgt_ref, sum_ref, cnt_ref, *, vocab):
    t = pl.program_id(1)
    v = pl.program_id(2)
    nt = pl.num_programs(1)
    nv = pl.num_programs(2)

    @pl.when(jnp.logical_and(t == 0, v == 0))
    def _():
        sum_ref[...] = jnp.zeros_like(sum_ref)
        cnt_ref[...] = jnp.zeros_like(cnt_ref)

    @pl.when(v == 0)
    def _():
        m_ref[...] = jnp.full_like(m_ref, -1e30)
        l_ref[...] = jnp.zeros_like(l_ref)
        tgt_ref[...] = jnp.zeros_like(tgt_ref)

    x = logits_ref[...]                          # (tm, tv), native dtype
    labels = labels_ref[...]                     # (tm, 1), int32
    tv = x.shape[1]
    col = jax.lax.broadcasted_iota(jnp.int32, x.shape, 1) + v * tv
    in_vocab = col < vocab                       # masks the ragged last V tile

    neg = jnp.finfo(x.dtype).min
    blk_max = jnp.max(jnp.where(in_vocab, x, neg),
                      axis=-1, keepdims=True).astype(jnp.float32)
    m_new = jnp.maximum(m_ref[...], blk_max)

    e = jnp.where(in_vocab, jnp.exp(x.astype(jnp.float32) - m_new), 0.0)
    l_ref[...] = (l_ref[...] * jnp.exp(m_ref[...] - m_new)
                  + jnp.sum(e, axis=-1, keepdims=True))
    tgt_ref[...] += jnp.sum(jnp.where(col == labels, x, jnp.zeros_like(x)),
                            axis=-1, keepdims=True).astype(jnp.float32)
    m_ref[...] = m_new

    @pl.when(v == nv - 1)
    def _():
        valid = labels != IGNORE_INDEX
        per_row = jnp.where(valid,
                            jnp.log(l_ref[...]) + m_ref[...] - tgt_ref[...],
                            0.0)
        sum_ref[...] += jnp.sum(per_row, axis=(0, 1), keepdims=True)
        cnt_ref[...] += jnp.sum(valid.astype(jnp.float32), axis=(0, 1),
                                keepdims=True)

    @pl.when(jnp.logical_and(t == nt - 1, v == nv - 1))
    def _():
        sub = jax.lax.broadcasted_iota(jnp.int32, out_ref.shape, 0)
        out_ref[...] = jnp.where(sub == 0, sum_ref[...],
                                 jnp.where(sub == 1, cnt_ref[...], 0.0))


def _ce_rows_vocab_tiled(logits, labels, *, tile_rows=None, tile_v=None):
    N, V = logits.shape
    budget, vmem_limit = _vmem_params()
    itemsize = logits.dtype.itemsize
    align = _sublane_align(logits.dtype)

    if tile_v is None:
        tile_v = min(2048, _round_up(V, 128))
    tile_v = int(min(tile_v, _round_up(V, 128)))
    if tile_v >= V:
        tile_v = V
    assert tile_v == V or tile_v % 128 == 0, "vocab tile must be lane-aligned"

    if tile_rows is None:
        per_unit = tile_v * (2 * itemsize + 8) + 64
        tile_rows = max(align, (budget // per_unit) // align * align)
        tile_rows = min(tile_rows, 512)
    tile_rows = int(min(tile_rows, N))

    n_blocks = pl.cdiv(N, tile_rows)
    v_blocks = pl.cdiv(V, tile_v)
    num_super, tiles_per = _split_grid(n_blocks)
    n_pad = num_super * tiles_per * tile_rows

    labels_p = jnp.pad(labels.astype(jnp.int32), (0, n_pad - N),
                       constant_values=IGNORE_INDEX).reshape(n_pad, 1)

    kernel = functools.partial(_ce_vocab_tiled_kernel, vocab=V)
    out = pl.pallas_call(
        kernel,
        out_shape=jax.ShapeDtypeStruct((num_super * 8, 128), jnp.float32),
        grid_spec=pltpu.PrefetchScalarGridSpec(
            num_scalar_prefetch=0,
            grid=(num_super, tiles_per, v_blocks),
            in_specs=[
                pl.BlockSpec((tile_rows, tile_v),
                             lambda s, t, v, tp=tiles_per, last=n_blocks - 1:
                                 (jnp.minimum(s * tp + t, last), v)),
                pl.BlockSpec((tile_rows, 1),
                             lambda s, t, v, tp=tiles_per: (s * tp + t, 0)),
            ],
            out_specs=pl.BlockSpec((8, 128), lambda s, t, v: (s, 0)),
            scratch_shapes=[pltpu.VMEM((tile_rows, 1), jnp.float32),
                            pltpu.VMEM((tile_rows, 1), jnp.float32),
                            pltpu.VMEM((tile_rows, 1), jnp.float32),
                            pltpu.VMEM((1, 1), jnp.float32),
                            pltpu.VMEM((1, 1), jnp.float32)],
        ),
        compiler_params=pltpu.CompilerParams(
            dimension_semantics=("parallel", "arbitrary", "arbitrary"),
            vmem_limit_bytes=vmem_limit),
    )(logits, labels_p)
    return _reduce_partials(out)


def masked_cross_entropy(logits, labels):
    """logits: (N, V) float, labels: (N,) int with -100 == ignore (mean CE)."""
    _, V = logits.shape
    if V < 128:
        # Narrow vocab: make the row axis lane-dense.
        # TODO(synk): have the producer emit (V, N) directly to skip this
        # HBM transpose.
        return masked_cross_entropy_transposed(logits.T, labels)
    budget, _ = _vmem_params()
    align = _sublane_align(logits.dtype)
    per_row = V * (2 * logits.dtype.itemsize + 8) + 64
    rows_fit = (budget // per_row) // align * align
    if rows_fit < 128:
        # Very wide vocab would starve the row tile -> online-softmax variant.
        return _ce_rows_vocab_tiled(logits, labels)
    return _ce_rows(logits, labels)


# ---------------------------------------------------------------------------
# Kernel 2: InfoNCE loss.  Tiny num_nc stays in plain JAX; moderate N uses a
# single-block Pallas kernel (RHS in (D, N) layout -> no XLU transpose,
# rsqrt row-normalisation on the EUP, temperature folded into the LHS).
# ---------------------------------------------------------------------------
def _infonce_jax(fea, hidden_html, temperature):
    fea = fea.astype(jnp.float32)
    hid = hidden_html.astype(jnp.float32)
    fea = fea * jax.lax.rsqrt(jnp.maximum(jnp.sum(fea * fea, -1, keepdims=True),
                                          1e-24))
    hid = hid * jax.lax.rsqrt(jnp.maximum(jnp.sum(hid * hid, -1, keepdims=True),
                                          1e-24))
    sim = jnp.dot(fea, hid.T) / temperature
    lse = jax.scipy.special.logsumexp(sim, axis=-1)
    return jnp.mean(lse - jnp.diag(sim))


def _infonce_kernel(fea_ref, hid_t_ref, out_ref, *, inv_temp, inv_n):
    fea = fea_ref[...].astype(jnp.float32)        # (N, D)
    hid = hid_t_ref[...].astype(jnp.float32)      # (D, N), pre-transposed RHS

    fea_inv = jax.lax.rsqrt(
        jnp.maximum(jnp.sum(fea * fea, axis=-1, keepdims=True), 1e-24))
    hid_inv = jax.lax.rsqrt(
        jnp.maximum(jnp.sum(hid * hid, axis=0, keepdims=True), 1e-24))
    fea_n = fea * (fea_inv * inv_temp)            # temperature folded into LHS
    hid_n = hid * hid_inv

    sim = jnp.dot(fea_n, hid_n, preferred_element_type=jnp.float32)   # (N, N)

    m = jnp.max(sim, axis=-1, keepdims=True)
    lse = jnp.log(jnp.sum(jnp.exp(sim - m), axis=-1, keepdims=True)) + m

    row = jax.lax.broadcasted_iota(jnp.int32, sim.shape, 0)
    col = jax.lax.broadcasted_iota(jnp.int32, sim.shape, 1)
    diag = jnp.sum(jnp.where(row == col, sim, 0.0), axis=-1, keepdims=True)

    out_ref[...] = jnp.sum(lse - diag, axis=(0, 1), keepdims=True) * inv_n


def _infonce_pallas(fea, hidden_html, temperature):
    N, D = fea.shape
    _, vmem_limit = _vmem_params()
    kernel = functools.partial(_infonce_kernel,
                               inv_temp=1.0 / float(temperature),
                               inv_n=1.0 / float(N))
    out = pl.pallas_call(
        kernel,
        out_shape=jax.ShapeDtypeStruct((1, 1), jnp.float32),
        grid_spec=pltpu.PrefetchScalarGridSpec(
            num_scalar_prefetch=0,
            grid=(1,),
            in_specs=[pl.BlockSpec((N, D), lambda i: (0, 0)),
                      pl.BlockSpec((D, N), lambda i: (0, 0))],
            out_specs=pl.BlockSpec((1, 1), lambda i: (0, 0)),
        ),
        compiler_params=pltpu.CompilerParams(vmem_limit_bytes=vmem_limit),
    )(fea, hidden_html.T)                          # (D, N): no in-kernel transpose
    return out[0, 0]


def infonce_loss(fea, hidden_html, *, temperature):
    N, _ = fea.shape
    if N < 256 or N * N * 4 > 16 * 1024 * 1024:
        # Tiny num_nc: a kernel is pure launch/DMA overhead; let XLA fuse it
        # with the preceding gather.  Huge num_nc needs a tiled kernel.
        # TODO(synk): flash-style (qi, ki)-tiled InfoNCE for num_nc >> 2048.
        return _infonce_jax(fea, hidden_html, temperature)
    return _infonce_pallas(fea, hidden_html, temperature)


# ---------------------------------------------------------------------------
# VastLoss forward (glue in plain JAX, losses via the Pallas kernels above).
# ---------------------------------------------------------------------------
def vast_loss(pred, batch, *, html_weight, coord_weight, visual_align_weight,
              temperature):
    html_hidden = pred['html_hidden']          # (b, L, d_model)
    pred_htmls = pred['html_out']              # (b, L-1, vocab)
    pred_coords = pred['coord_out']            # (b, L-1, 4, bins)
    roi_features = pred['roi_features']        # (num_nc, d_model) or None

    padding_masks = batch['padding_mask'][:, 1:]            # (b, L-1)
    bbox_masks = batch['bbox_masks']                        # (b, L, 1)
    labels = batch['structure'][:, 1:]                      # (b, L-1)
    labels = jnp.where(padding_masks == 1, labels, IGNORE_INDEX)

    # html structure loss (native-dtype logits, no HBM-side pad / copy)
    b, l, vocab = pred_htmls.shape
    html_loss = masked_cross_entropy(
        pred_htmls.reshape(b * l, vocab), labels.reshape(-1))

    # coordinate loss
    coords = batch['abs_bboxes'][:, 1:, :].astype(jnp.int32)       # (b, L-1, 4)
    coord_masks = jnp.repeat(bbox_masks[:, 1:, :], 4, axis=-1)      # (b, L-1, 4)
    coords_flat = jnp.where(coord_masks.reshape(-1) == 1,
                            coords.reshape(-1), IGNORE_INDEX)
    bins = pred_coords.shape[-1]
    if bins < 128:
        # Lane-dense layout for the narrow coordinate vocabulary.
        # TODO(synk): have the coord projection emit (bins, b*l*4) directly so
        # this moveaxis (one HBM read+write of the coord logits) disappears.
        coord_logits_t = jnp.moveaxis(pred_coords, -1, 0).reshape(bins, -1)
        coord_loss = masked_cross_entropy_transposed(coord_logits_t, coords_flat)
    else:
        coord_loss = masked_cross_entropy(
            pred_coords.reshape(-1, bins), coords_flat)

    # visual alignment (InfoNCE) loss
    if roi_features is not None:
        num_nc = roi_features.shape[0]
        # Data-dependent gather stays in XLA; assumes exactly num_nc cells are
        # non-empty (module contract — nonzero pads with index 0 otherwise).
        nc_indices = jnp.nonzero(bbox_masks.reshape(-1), size=num_nc)[0]
        d_model = html_hidden.shape[-1]
        nc_html_hidden = html_hidden.reshape(-1, d_model)[nc_indices]
        visual_align_loss = infonce_loss(
            roi_features, nc_html_hidden, temperature=temperature)
    else:
        visual_align_loss = jnp.float32(0.0)

    total = (html_weight * html_loss + coord_weight * coord_loss
             + visual_align_weight * visual_align_loss)
    return {'html_loss': html_loss,
            'coord_loss': coord_loss,
            'visual_align_loss': visual_align_loss,
            'total_loss': total}


# ---------------------------------------------------------------------------
# Pure-JAX references (sanity checks only).
# ---------------------------------------------------------------------------
def _ref_ce(logits, labels):
    valid = labels != IGNORE_INDEX
    lg = logits.astype(jnp.float32)
    lse = jax.scipy.special.logsumexp(lg, axis=-1)
    safe = jnp.maximum(labels, 0)
    tgt = jnp.take_along_axis(lg, safe[:, None], axis=-1)[:, 0]
    return jnp.sum(jnp.where(valid, lse - tgt, 0.0)) / jnp.sum(valid)


def _ref_infonce(fea, hid, temperature):
    fea = fea / jnp.maximum(jnp.linalg.norm(fea, axis=-1, keepdims=True), 1e-12)
    hid = hid / jnp.maximum(jnp.linalg.norm(hid, axis=-1, keepdims=True), 1e-12)
    sim = (fea @ hid.T) / temperature
    lse = jax.scipy.special.logsumexp(sim, axis=-1)
    return jnp.mean(lse - jnp.diag(sim))


if __name__ == "__main__":
    # Small, deterministic synthetic configuration.
    b, L = 2, 9                 # full sequence length (first token is dropped)
    l = L - 1                   # 8
    vocab = 256                 # html structure vocabulary (>=128: row kernel)
    bins = 16                   # coordinate bins (<128: lane-dense column kernel)
    d_model = 32
    nc_per_row = 6
    num_nc = b * nc_per_row     # 12 non-empty cells

    html_weight, coord_weight, visual_align_weight = 1.0, 0.5, 0.25
    temperature = 0.07

    key = jax.random.PRNGKey(0)
    k1, k2, k3, k4, k5, k6 = jax.random.split(key, 6)

    pred = {
        'html_out': jax.random.normal(k1, (b, l, vocab), jnp.float32),
        'coord_out': jax.random.normal(k2, (b, l, 4, bins), jnp.float32),
        'html_hidden': jax.random.normal(k3, (b, L, d_model), jnp.float32),
        'roi_features': jax.random.normal(k4, (num_nc, d_model), jnp.float32),
    }

    padding_mask = jnp.zeros((b, L), jnp.int32).at[:, :7].set(1)
    bbox_masks = jnp.zeros((b, L, 1), jnp.int32).at[:, :nc_per_row, :].set(1)
    batch = {
        'padding_mask': padding_mask,
        'bbox_masks': bbox_masks,
        'structure': jax.random.randint(k5, (b, L), 0, vocab, jnp.int32),
        'abs_bboxes': jax.random.randint(k6, (b, L, 4), 0, bins, jnp.int32),
    }

    out = vast_loss(pred, batch,
                    html_weight=html_weight,
                    coord_weight=coord_weight,
                    visual_align_weight=visual_align_weight,
                    temperature=temperature)
    out = jax.tree_util.tree_map(jax.block_until_ready, out)

    # Sanity checks against pure-JAX references.
    labels_ref = jnp.where(padding_mask[:, 1:] == 1,
                           batch['structure'][:, 1:], IGNORE_INDEX).reshape(-1)
    ref_html = _ref_ce(pred['html_out'].reshape(-1, vocab), labels_ref)
    cm = jnp.repeat(bbox_masks[:, 1:, :], 4, axis=-1).reshape(-1)
    coords_ref = jnp.where(cm == 1, batch['abs_bboxes'][:, 1:, :].reshape(-1),
                           IGNORE_INDEX)
    ref_coord = _ref_ce(pred['coord_out'].reshape(-1, bins), coords_ref)
    idx = jnp.nonzero(bbox_masks.reshape(-1), size=num_nc)[0]
    ref_nce = _ref_infonce(pred['roi_features'],
                           pred['html_hidden'].reshape(-1, d_model)[idx],
                           temperature)

    assert jnp.allclose(out['html_loss'], ref_html, rtol=1e-3, atol=1e-3)
    assert jnp.allclose(out['coord_loss'], ref_coord, rtol=1e-3, atol=1e-3)
    assert jnp.allclose(out['visual_align_loss'], ref_nce, rtol=1e-3, atol=1e-3)

    # Extra checks: multi-tile row kernel (ragged tail, clamped index_map),
    # vocab-tiled online-softmax kernel, and the Pallas InfoNCE path.
    ka, kb, kc, kd, ke, kf = jax.random.split(jax.random.PRNGKey(1), 6)
    n2, v2 = 200, 256
    lg2 = jax.random.normal(ka, (n2, v2), jnp.float32)
    lb2 = jax.random.randint(kb, (n2,), 0, v2, jnp.int32)
    lb2 = jnp.where(jax.random.uniform(kc, (n2,)) < 0.2, IGNORE_INDEX, lb2)
    got_rows = _ce_rows(lg2, lb2, tile_rows=64)
    assert jnp.allclose(got_rows, _ref_ce(lg2, lb2), rtol=1e-3, atol=1e-3)

    n3, v3 = 200, 320
    lg3 = jax.random.normal(kd, (n3, v3), jnp.float32)
    got_vt = _ce_rows_vocab_tiled(lg3, lb2, tile_rows=64, tile_v=128)
    assert jnp.allclose(got_vt, _ref_ce(lg3, lb2), rtol=1e-3, atol=1e-3)

    nn, dn = 256, 64
    fa = jax.random.normal(ke, (nn, dn), jnp.float32)
    hb = jax.random.normal(kf, (nn, dn), jnp.float32)
    got_nce = jax.block_until_ready(_infonce_pallas(fa, hb, temperature))
    # Looser tolerance: MXU default precision (bf16 passes) in both kernel
    # and the XLA reference matmul.
    assert jnp.allclose(got_nce, _ref_infonce(fa, hb, temperature),
                        rtol=2e-2, atol=5e-2)

    print("KERNEL_OK")
</pallas_src>

<mosaic_0001>
module attributes {stable_mosaic.version = 11 : i64} {
  func.func @_ce_row_kernel(%arg0: i32, %arg1: i32, %arg2: memref<16x256xf32, #tpu.memory_space<vmem>>, %arg3: memref<16x1xi32, #tpu.memory_space<vmem>>, %arg4: memref<8x128xf32, #tpu.memory_space<vmem>>, %arg5: memref<1x1xf32, #tpu.memory_space<vmem>>, %arg6: memref<1x1xf32, #tpu.memory_space<vmem>>) attributes {dimension_semantics = [#tpu.dimension_semantics<parallel>, #tpu.dimension_semantics<arbitrary>], iteration_bounds = array<i64: 1, 1>, scalar_prefetch = 0 : i64, scratch_operands = 2 : i64, tpu.core_type = #tpu.core_type<tc>, window_params = [{transform_indices = @transform_0, window_bounds = array<i64: 16, 256>}, {transform_indices = @transform_1, window_bounds = array<i64: 16, 1>}, {transform_indices = @transform_2, window_bounds = array<i64: 8, 128>}]} {
    %c0_i32 = arith.constant 0 : i32
    %0 = arith.cmpi eq, %arg1, %c0_i32 : i32
    %1 = arith.extui %0 : i1 to i32
    %c0_i32_0 = arith.constant 0 : i32
    %2 = arith.cmpi ne, %1, %c0_i32_0 : i32
    scf.if %2 {
      %cst_20 = arith.constant 0.000000e+00 : f32
      %47 = vector.broadcast %cst_20 : f32 to vector<1x1xf32>
      %c0_21 = arith.constant 0 : index
      %c0_22 = arith.constant 0 : index
      %48 = vector.load %arg5[%c0_21, %c0_22] : memref<1x1xf32, #tpu.memory_space<vmem>>, vector<1x1xf32>
      tpu.vector_store %arg5[%c0_21, %c0_22], %47 {strides = array<i32>} : memref<1x1xf32, #tpu.memory_space<vmem>>, vector<1x1xf32>,
      %cst_23 = arith.constant 0.000000e+00 : f32
      %49 = vector.broadcast %cst_23 : f32 to vector<1x1xf32>
      %c0_24 = arith.constant 0 : index
      %c0_25 = arith.constant 0 : index
      %50 = vector.load %arg6[%c0_24, %c0_25] : memref<1x1xf32, #tpu.memory_space<vmem>>, vector<1x1xf32>
      tpu.vector_store %arg6[%c0_24, %c0_25], %49 {strides = array<i32>} : memref<1x1xf32, #tpu.memory_space<vmem>>, vector<1x1xf32>,
    } else {
    }
    %c0 = arith.constant 0 : index
    %c0_1 = arith.constant 0 : index
    %3 = vector.load %arg2[%c0, %c0_1] : memref<16x256xf32, #tpu.memory_space<vmem>>, vector<16x256xf32>
    %c0_2 = arith.constant 0 : index
    %c0_3 = arith.constant 0 : index
    %4 = vector.load %arg3[%c0_2, %c0_3] : memref<16x1xi32, #tpu.memory_space<vmem>>, vector<16x1xi32>
    %cst = arith.constant dense<0xFF800000> : vector<16xf32>
    %5 = vector.multi_reduction <maximumf>, %3, %cst [1] : vector<16x256xf32> to vector<16xf32>
    %6 = vector.shape_cast %5 : vector<16xf32> to vector<16x1xf32>
    %7 = vector.broadcast %6 : vector<16x1xf32> to vector<16x256xf32>
    %8 = arith.subf %3, %7 : vector<16x256xf32>
    %9 = math.exp %8 : vector<16x256xf32>
    %cst_4 = arith.constant dense<0.000000e+00> : vector<16xf32>
    %10 = vector.multi_reduction <add>, %9, %cst_4 [1] : vector<16x256xf32> to vector<16xf32>
    %11 = vector.shape_cast %10 : vector<16xf32> to vector<16x1xf32>
    %12 = math.log %11 : vector<16x1xf32>
    %13 = arith.addf %12, %6 : vector<16x1xf32>
    %14 = tpu.iota {dimensions = array<i32: 1>} : vector<16x256xi32>
    %15 = vector.broadcast %4 : vector<16x1xi32> to vector<16x256xi32>
    %16 = arith.cmpi eq, %14, %15 : vector<16x256xi32>
    %cst_5 = arith.constant 0.000000e+00 : f32
    %17 = vector.broadcast %cst_5 : f32 to vector<16x256xf32>
    %18 = arith.select %16, %3, %17 : vector<16x256xi1>, vector<16x256xf32>
    %cst_6 = arith.constant dense<0.000000e+00> : vector<16xf32>
    %19 = vector.multi_reduction <add>, %18, %cst_6 [1] : vector<16x256xf32> to vector<16xf32>
    %20 = vector.shape_cast %19 : vector<16xf32> to vector<16x1xf32>
    %c-100_i32 = arith.constant -100 : i32
    %21 = vector.broadcast %c-100_i32 : i32 to vector<16x1xi32>
    %22 = arith.cmpi ne, %4, %21 : vector<16x1xi32>
    %23 = arith.subf %13, %20 : vector<16x1xf32>
    %cst_7 = arith.constant 0.000000e+00 : f32
    %24 = vector.broadcast %cst_7 : f32 to vector<16x1xf32>
    %25 = arith.select %22, %23, %24 : vector<16x1xi1>, vector<16x1xf32>
    %c0_8 = arith.constant 0 : index
    %c0_9 = arith.constant 0 : index
    %26 = vector.load %arg5[%c0_8, %c0_9] : memref<1x1xf32, #tpu.memory_space<vmem>>, vector<1x1xf32>
    %27 = vector.shape_cast %25 : vector<16x1xf32> to vector<1x16x1xf32>
    %cst_10 = arith.constant dense<0.000000e+00> : vector<1xf32>
    %28 = vector.multi_reduction <add>, %27, %cst_10 [1, 2] : vector<1x16x1xf32> to vector<1xf32>
    %29 = vector.shape_cast %28 : vector<1xf32> to vector<1x1x1xf32>
    %30 = vector.extract %29[0, 0, 0] : f32 from vector<1x1x1xf32>
    %31 = vector.broadcast %30 : f32 to vector<1x1xf32>
    %32 = arith.addf %26, %31 : vector<1x1xf32>
    %c0_11 = arith.constant 0 : index
    %c0_12 = arith.constant 0 : index
    %33 = vector.load %arg5[%c0_11, %c0_12] : memref<1x1xf32, #tpu.memory_space<vmem>>, vector<1x1xf32>
    tpu.vector_store %arg5[%c0_11, %c0_12], %32 {strides = array<i32>} : memref<1x1xf32, #tpu.memory_space<vmem>>, vector<1x1xf32>,
    %c0_13 = arith.constant 0 : index
    %c0_14 = arith.constant 0 : index
    %34 = vector.load %arg6[%c0_13, %c0_14] : memref<1x1xf32, #tpu.memory_space<vmem>>, vector<1x1xf32>
    %35 = arith.extui %22 : vector<16x1xi1> to vector<16x1xi32>
    %36 = arith.sitofp %35 : vector<16x1xi32> to vector<16x1xf32>
    %37 = vector.shape_cast %36 : vector<16x1xf32> to vector<1x16x1xf32>
    %cst_15 = arith.constant dense<0.000000e+00> : vector<1xf32>
    %38 = vector.multi_reduction <add>, %37, %cst_15 [1, 2] : vector<1x16x1xf32> to vector<1xf32>
    %39 = vector.shape_cast %38 : vector<1xf32> to vector<1x1x1xf32>
    %40 = vector.extract %39[0, 0, 0] : f32 from vector<1x1x1xf32>
    %41 = vector.broadcast %40 : f32 to vector<1x1xf32>
    %42 = arith.addf %34, %41 : vector<1x1xf32>
    %c0_16 = arith.constant 0 : index
    %c0_17 = arith.constant 0 : index
    %43 = vector.load %arg6[%c0_16, %c0_17] : memref<1x1xf32, #tpu.memory_space<vmem>>, vector<1x1xf32>
    tpu.vector_store %arg6[%c0_16, %c0_17], %42 {strides = array<i32>} : memref<1x1xf32, #tpu.memory_space<vmem>>, vector<1x1xf32>,
    %c0_i32_18 = arith.constant 0 : i32
    %44 = arith.cmpi eq, %arg1, %c0_i32_18 : i32
    %45 = arith.extui %44 : i1 to i32
    %c0_i32_19 = arith.constant 0 : i32
    %46 = arith.cmpi ne, %45, %c0_i32_19 : i32
    scf.if %46 {
      %47 = tpu.iota {dimensions = array<i32: 0>} : vector<8x128xi32>
      %c0_i32_20 = arith.constant 0 : i32
      %48 = vector.broadcast %c0_i32_20 : i32 to vector<8x128xi32>
      %49 = arith.cmpi eq, %47, %48 : vector<8x128xi32>
      %c0_21 = arith.constant 0 : index
      %c0_22 = arith.constant 0 : index
      %50 = vector.load %arg5[%c0_21, %c0_22] : memref<1x1xf32, #tpu.memory_space<vmem>>, vector<1x1xf32>
      %c1_i32 = arith.constant 1 : i32
      %51 = vector.broadcast %c1_i32 : i32 to vector<8x128xi32>
      %52 = arith.cmpi eq, %47, %51 : vector<8x128xi32>
      %c0_23 = arith.constant 0 : index
      %c0_24 = arith.constant 0 : index
      %53 = vector.load %arg6[%c0_23, %c0_24] : memref<1x1xf32, #tpu.memory_space<vmem>>, vector<1x1xf32>
      %cst_25 = arith.constant 0.000000e+00 : f32
      %54 = vector.shape_cast %53 : vector<1x1xf32> to vector<1x1xf32>
      %55 = vector.broadcast %54 : vector<1x1xf32> to vector<8x128xf32>
      %56 = vector.broadcast %cst_25 : f32 to vector<8x128xf32>
      %57 = arith.select %52, %55, %56 : vector<8x128xi1>, vector<8x128xf32>
      %58 = vector.shape_cast %50 : vector<1x1xf32> to vector<1x1xf32>
      %59 = vector.broadcast %58 : vector<1x1xf32> to vector<8x128xf32>
      %60 = arith.select %49, %59, %57 : vector<8x128xi1>, vector<8x128xf32>
      %c0_26 = arith.constant 0 : index
      %c0_27 = arith.constant 0 : index
      %61 = vector.load %arg4[%c0_26, %c0_27] : memref<8x128xf32, #tpu.memory_space<vmem>>, vector<8x128xf32>
      tpu.vector_store %arg4[%c0_26, %c0_27], %60 {strides = array<i32>} : memref<8x128xf32, #tpu.memory_space<vmem>>, vector<8x128xf32>,
    } else {
    }
    return
  }
  func.func @transform_0(%arg0: i32, %arg1: i32) -> (i32, i32) {
    %c1_i32 = arith.constant 1 : i32
    %0 = arith.muli %arg0, %c1_i32 : i32
    %1 = arith.addi %0, %arg1 : i32
    %c0_i32 = arith.constant 0 : i32
    %2 = arith.minsi %1, %c0_i32 : i32
    %c0_i32_0 = arith.constant 0 : i32
    %c0_i32_1 = arith.constant 0 : i32
    return %2, %c0_i32_0 : i32, i32
  }
  func.func @transform_1(%arg0: i32, %arg1: i32) -> (i32, i32) {
    %c1_i32 = arith.constant 1 : i32
    %0 = arith.muli %arg0, %c1_i32 : i32
    %1 = arith.addi %0, %arg1 : i32
    %c0_i32 = arith.constant 0 : i32
    %c0_i32_0 = arith.constant 0 : i32
    return %1, %c0_i32 : i32, i32
  }
  func.func @transform_2(%arg0: i32, %arg1: i32) -> (i32, i32) {
    %c0_i32 = arith.constant 0 : i32
    %c0_i32_0 = arith.constant 0 : i32
    return %arg0, %c0_i32 : i32, i32
  }
}

</mosaic_0001>

<bundles_post_ra>
// kernel: tpu_custom_call.1
= control target key start
LH: loop header
LB: loop body
LE: loop exit
PB: predicated region body
PF: predicated region fallthrough
CT: control target
= control target key end

     0   :  { %7 = vsyncpa [#allocation5], 0  ;;  %s353_s0 = inlined_call_operand.hbm [shape: f32[16,256], index: 0, kind: input, shape index: {}]   ;;  %s354_s1 = inlined_call_operand.vmem [shape: s32[16,1], index: 1, kind: input, shape index: {}]   ;;  %s355_s2 = inlined_call_operand.hbm [shape: f32[8,128], index: 2, kind: output, shape index: {}]  }
   0x1   :  { %8 = vsyncpa [#allocation6], 0  ;;  %s294_s9 = smov [#allocation4]  }
   0x2   :  { %s21_s10 = sshll.u32 %s294_s9, 4  ;;  %s22_s10 = int_to_ptr.vmem [resolvable:$true] %s21_s10 }
   0x3   :  { %s258_s11 = scalar_lea.vmem %s22_s10, 512  ;;  %p263_p1 = scmp.lt.s32.totalorder %s22_s10, %s22_s10 }
   0x4   :  { %p259_p0 = scmp.ne.s32.totalorder %s22_s10, %s258_s11  ;;  %p264_p2 = scmp.lt.s32.totalorder %s258_s11, %s258_s11 }
   0x6   :  { %p265_p3 = por %p264_p2, %p263_p1 }
   0x8   :  { %p266_p4 = pnand %p265_p3, %p259_p0 }
   0xa   :  { %269 = shalt.err (!%p266_p4)
}
   0xb   :  { %s295_s12 = smov 256   ;;  %s296_s13 = smov 16  }
   0xc   :  { %27 = dma.hbm_to_vmem [thread:$0]  %s353_s0, 512, %s22_s10, [#allocation5], %s295_s12, %s295_s12, %s296_s13  }
   0xd   :  { %290 = dma.done.wait [#allocation5], 512  }
   0xe   :  { %291 = vsyncadd [#allocation5], 4294966784  ;;  %vm63_vm0 = vcmask 0   ;;  %v297_v0 = vmov 0   ;;  %v298_v1 = vmov 0.0   ;;  %v66_v2 = vld [vmem:[#allocation4] sm:$0xff]  ;;  %v102_v16 = vlaneseq }
   0xf   :  { %236 = vset.pattern.permute.xlu1 %v297_v0  ;;  %64 = vst.msk [vmem:[#allocation2] sm:$0x1] %vm63_vm0, %v298_v1  ;;  %65 = vst.msk [vmem:[#allocation3] sm:$0x1] %vm63_vm0, %v298_v1  ;;  %237 = vset.pattern.permute.xlu0 %v297_v0  ;;  %v67_v3 = vld [vmem:[#allocation4 + $0x8] sm:$0xff]  ;;  %v68_v4 = vld [vmem:[#allocation4 + $0x10] sm:$0xff] }
  0x10   :  { %v72_v5 = vmax.f32 %v66_v2, %v67_v3  ;;  %v69_v6 = vld [vmem:[#allocation4 + $0x18] sm:$0xff]  ;;  %v329_v9 = vld [vmem:[%s354_s1 + $0x8] sm:$0xff]  ;;  %v103_v21 = vand.u32 127, %v102_v16  ;;  %vm132_vm7 = vcmask 7168   ;;  %s299_s20 = smov [#allocation7]  }
  0x11   :  { %v323_v7 = vld [vmem:[%s354_s1] sm:$0xff]  ;;  %v75_v8 = vmax.f32 %v68_v4, %v69_v6  ;;  %vm126_vm6 = vcmp.ne.s32.totalorder %v329_v9, 4294967196  ;;  %s205_s21 = sshll.u32 %s299_s20, 4  ;;  %s206_s21 = int_to_ptr.vmem [resolvable:$true] %s205_s21 }
  0x12   :  { %106 = vperm.xlu1 %236, %v323_v7   ;;  %73 = vmax.xlane.f32.xlu0 %v72_v5  ;;  %v104_v23 = vadd.s32 128, %v103_v21  ;;  %vm125_vm5 = vcmp.ne.s32.totalorder %v323_v7, 4294967196  ;;  %v223_v38 = vsel %vm126_vm6, 1.0, %v298_v1  ;;  %s270_s22 = scalar_lea.vmem %s206_s21, 128  ;;  %p275_p6 = scmp.lt.s32.totalorder %s206_s21, %s206_s21 }
  0x13   :  { %v222_v37 = vsel %vm125_vm5, 1.0, %v298_v1  ;;  %v155_v40 = vsel %vm132_vm7, %v223_v38, 0.0  ;;  %p271_p5 = scmp.ne.s32.totalorder %s206_s21, %s270_s22  ;;  %p276_p7 = scmp.lt.s32.totalorder %s270_s22, %s270_s22 }
  0x14   :  { %v154_v39 = vsel %vm132_vm7, %v222_v37, 0.0 }
  0x15   :  { %v156_v41 = vadd.f32 %v155_v40, %v154_v39  ;;  %p277_p8 = por %p276_p7, %p275_p6 }
  0x16   :  { %109 = vperm.xlu1 %236, %v329_v9   ;;  %76 = vmax.xlane.f32.xlu0 %v75_v8  ;;  %v131_v9 = vld [vmem:[#allocation2] sm:$0x1] }
  0x17   :  { %p278_p9 = pnand %p277_p8, %p271_p5 }
  0x8d   :  { %v107_v22 = vpop.permute.xlu1 %106 }
  0x8e   :  { %vm111_vm1 = vcmp.eq.s32.totalorder %v103_v21, %v107_v22  ;;  %vm112_vm2 = vcmp.eq.s32.totalorder %v104_v23, %v107_v22 }
  0x8f   :  { %v115_v27 = vsel %vm111_vm1, %v66_v2, 0.0  ;;  %v116_v28 = vsel %vm112_vm2, %v67_v3, 0.0 }
  0x90   :  { %v119_v31 = vadd.f32 %v116_v28, %v115_v27 }
  0x91   :  { %v110_v24 = vpop.permute.xlu1 %109 }
  0x92   :  { %vm113_vm3 = vcmp.eq.s32.totalorder %v103_v21, %v110_v24  ;;  %vm114_vm4 = vcmp.eq.s32.totalorder %v104_v23, %v110_v24 }
  0x93   :  { %v117_v33 = vsel %vm113_vm3, %v68_v4, 0.0  ;;  %v118_v34 = vsel %vm114_vm4, %v69_v6, 0.0 }
  0x94   :  { %v122_v36 = vadd.f32 %v118_v34, %v117_v33 }
  0x9b   :  { %v74_v10 = vpop.xlane.xlu0 %73 }
  0x9c   :  { %v78_v11 = vsub.f32 %v66_v2, %v74_v10  ;;  %v79_v12 = vsub.f32 %v67_v3, %v74_v10 }
  0x9e   :  { %v82_v13 = vmul.f32 1.442695, %v78_v11  ;;  %v84_v14 = vmul.f32 1.442695, %v79_v12  ;;  %v149_v12 = vld [vmem:[#allocation3] sm:$0x1] }
  0x9f   :  { %v77_v15 = vpop.xlane.xlu0 %76 }
  0xa0   :  { %238 = vpow2.f32 %v82_v13  ;;  %v80_v17 = vsub.f32 %v68_v4, %v77_v15  ;;  %v81_v18 = vsub.f32 %v69_v6, %v77_v15 }
  0xa1   :  { %240 = vpow2.f32 %v84_v14 }
  0xa2   :  { %v86_v19 = vmul.f32 1.442695, %v80_v17  ;;  %v88_v20 = vmul.f32 1.442695, %v81_v18  ;;  %v173_v18 = vshrl.u32 %v102_v16, 7 }
  0xa4   :  { %242 = vpow2.f32 %v86_v19  ;;  %vm176_vm8 = vcmp.eq.s32.totalorder %v173_v18, 1  ;;  %vm174_vm9 = vcmp.eq.s32.totalorder %v173_v18, 0 }
  0xa5   :  { %244 = vpow2.f32 %v88_v20 }
  0xad   :  { %v239_v25 = vpop.eup %238 }
  0xae   :  { %v241_v26 = vpop.eup %240 }
  0xaf   :  { %v90_v29 = vadd.f32 %v241_v26, %v239_v25 }
  0xb1   :  { %v243_v30 = vpop.eup %242  ;;  %91 = vadd.xlane.f32.xlu0 %v90_v29 }
  0xb2   :  { %v245_v32 = vpop.eup %244 }
  0xb3   :  { %v93_v35 = vadd.f32 %v245_v32, %v243_v30 }
  0xb5   :  { %94 = vadd.xlane.f32.xlu1 %v93_v35  ;;  %120 = vadd.xlane.f32.xlu0 %v119_v31 }
  0xb9   :  { %123 = vadd.xlane.f32.xlu0 %v122_v36 }
 0x13a   :  { %v92_v42 = vpop.xlane.xlu0 %91 }
 0x13b   :  { %246 = vlog2.f32 %v92_v42 }
 0x13e   :  { %v95_v43 = vpop.xlane.xlu1 %94  ;;  %v121_v46 = vpop.xlane.xlu0 %120 }
 0x13f   :  { %248 = vlog2.f32 %v95_v43 }
 0x142   :  { %v124_v52 = vpop.xlane.xlu0 %123 }
 0x148   :  { %v247_v44 = vpop.eup %246 }
 0x149   :  { %v97_v45 = vmul.f32 0.6931472, %v247_v44 }
 0x14b   :  { %v100_v47 = vadd.f32 %v97_v45, %v74_v10 }
 0x14c   :  { %v249_v48 = vpop.eup %248 }
 0x14d   :  { %v99_v49 = vmul.f32 0.6931472, %v249_v48  ;;  %v127_v50 = vsub.f32 %v100_v47, %v121_v46 }
 0x14f   :  { %v101_v51 = vadd.f32 %v99_v49, %v77_v15  ;;  %v129_v53 = vsel %vm125_vm5, %v127_v50, 0.0 }
 0x150   :  { %v133_v56 = vsel %vm132_vm7, %v129_v53, 0.0 }
 0x151   :  { %v128_v54 = vsub.f32 %v101_v51, %v124_v52 }
 0x153   :  { %v130_v55 = vsel %vm126_vm6, %v128_v54, 0.0 }
 0x154   :  { %v134_v57 = vsel %vm132_vm7, %v130_v55, 0.0 }
 0x155   :  { %v135_v58 = vadd.f32 %v134_v57, %v133_v56 }
 0x157   :  { %136 = vadd.xlane.f32.xlu0 %v135_v58 }
 0x15b   :  { %157 = vadd.xlane.f32.xlu0 %v156_v41 }
 0x1e0   :  { %v137_v59 = vpop.xlane.xlu0 %136 }
 0x1e1   :  { %v138_v60 = vrot.slane %v137_v59, 4 }
 0x1e3   :  { %v139_v61 = vadd.f32 %v138_v60, %v137_v59 }
 0x1e4   :  { %v158_v62 = vpop.xlane.xlu0 %157 }
 0x1e5   :  { %v140_v63 = vrot.slane %v139_v61, 2  ;;  %v159_v0 = vrot.slane %v158_v62, 4 }
 0x1e7   :  { %v160_v1 = vadd.f32 %v159_v0, %v158_v62  ;;  %v141_v2 = vadd.f32 %v140_v63, %v139_v61 }
 0x1e9   :  { %v161_v3 = vrot.slane %v160_v1, 2  ;;  %v142_v4 = vrot.slane %v141_v2, 1 }
 0x1eb   :  { %v143_v5 = vadd.f32 %v142_v4, %v141_v2  ;;  %v162_v6 = vadd.f32 %v161_v3, %v160_v1 }
 0x1ed   :  { %226 = vpush %v143_v5  ;;  %v163_v7 = vrot.slane %v162_v6, 1 }
 0x1ef   :  { %v164_v8 = vadd.f32 %v163_v7, %v162_v6 }
 0x1f1   :  { %228 = vpush %v164_v8 }
 0x21e   :  { %s227_s1 = spop %226 }
 0x21f   :  { %v145_v10 = vstv %s227_s1 }
 0x220   :  { %v146_v11 = vadd.f32 %v145_v10, %v131_v9 }
 0x222   :  { %148 = vst.msk [vmem:[#allocation2] sm:$0x1] %vm63_vm0, %v146_v11  ;;  %s229_s19 = spop %228 }
 0x223   :  { %v166_v13 = vstv %s229_s19 }
 0x224   :  { %v167_v14 = vadd.f32 %v166_v13, %v149_v12 }
 0x226   :  { %168 = vst.msk [vmem:[#allocation3] sm:$0x1] %vm63_vm0, %v167_v14 }
 0x229   :  { %v225_v15 = vld [vmem:[#allocation2] ss:$0 sm:$0xff] }
 0x22a   :  { %194 = vperm.xlu1 %236, %v225_v15  }
 0x22d   :  { %v224_v17 = vld [vmem:[#allocation3] ss:$0 sm:$0xff] }
 0x22e   :  { %184 = vperm.xlu0 %237, %v224_v17  }
 0x2a5   :  { %v195_v20 = vpop.permute.xlu1 %194 }
 0x2a9   :  { %v185_v19 = vpop.permute.xlu0 %184 }
 0x2aa   :  { %v187_v21 = vsel %vm176_vm8, %v185_v19, 0.0 }
 0x2ab   :  { %v197_v22 = vsel %vm174_vm9, %v195_v20, %v187_v21 }
 0x2ac   :  { %198 = vst [vmem:[#allocation7] sm:$0xff] %v197_v22 }
 0x2ad   :  { %281 = shalt.err (!%p278_p9)
}
 0x2ae   :  { %208 = dma.vmem_to_hbm [thread:$0]  %s206_s21, 128, %s355_s2, [#allocation6]  }
 0x2af   :  { %292 = dma.done.wait [#allocation6], 128  }
 0x2b0   :  { %293 = vsyncadd [#allocation6], 4294967168 }
 0x2b1   :  { %212 = vsyncpa [#allocation5], 1 }
 0x2b2   :  { %213 = vsyncpa [#allocation6], 1 }

</bundles_post_ra>
